<compile_context>
chip_gen: v7x
topology: tpu7x:2x2x1
jax: 0.10.0
libtpu: 0.0.40
codegen_flags: <defaults>
</compile_context>

<pallas_src>
import functools

import jax
import jax.numpy as jnp
from jax.experimental import pallas as pl
from jax.experimental.pallas import tpu as pltpu

_LANE = 128                       # lane width (last-dim granularity)
_BF16_SUBLANE = 16                # bf16 min tile is (16, 128)
_DEF_TILE_B = 8192                # default batch tile (sweepable)
_VMEM_TILE_BUDGET = 24 * 1024 * 1024   # double-buffered x + out tile budget


def _round_up(n, m):
    return ((n + m - 1) // m) * m


def _patchtst_kernel(x_ref, w1_ref, b1_ref, w2_ref, b2_ref, o_ref):
    # x_ref : (tb, K)        input dtype (e.g. f32); cast to bf16 in-kernel
    # w1_ref: (K, H_pad)     bf16  flattened Conv1d weight (NO K padding)
    # b1_ref: (1, H_pad)     f32   conv bias (zero-padded cols)
    # w2_ref: (H_pad, N_pad) bf16  Linear weight, transposed + zero-padded
    # b2_ref: (1, N_pad)     f32   linear bias (zero-padded cols)
    # o_ref : (tb, N_pad)    bf16  lane-dense narrow writeback
    x = x_ref[...].astype(w1_ref.dtype)                              # free VPU cast
    h = jnp.dot(x, w1_ref[...], preferred_element_type=jnp.float32)  # MXU, f32 acc
    h = jnp.maximum(h + b1_ref[...], 0.0)                            # f32 bias+ReLU
    # NOTE: intentional bf16 re-quantization of h before the second matmul.
    y = jnp.dot(h.astype(w2_ref.dtype), w2_ref[...],
                preferred_element_type=jnp.float32) + b2_ref[...]
    o_ref[...] = y.astype(o_ref.dtype)


def prepare_params(conv_w, conv_b, lin_w, lin_b, patch_len,
                   compute_dtype=jnp.bfloat16):
    """One-time weight preprocessing (hoisted out of the per-call path).

    conv_w: (hidden, C_in, patch_len)  PyTorch Conv1d weight layout
    conv_b: (hidden,)
    lin_w : (output_dim, hidden)       PyTorch Linear weight layout
    lin_b : (output_dim,)
    """
    hidden, c_in, k = conv_w.shape
    assert k == patch_len
    out_dim = lin_w.shape[0]
    K = c_in * patch_len

    H_pad = _round_up(hidden, _LANE)
    N_pad = _round_up(out_dim, _LANE)

    # Conv1d weight flattened channel-major (matches x.reshape(B, C*P)).
    # K dimension is NOT padded: the x block keeps its true K as the last dim.
    w1 = conv_w.reshape(hidden, K).T.astype(compute_dtype)              # (K, hidden)
    w1 = jnp.zeros((K, H_pad), compute_dtype).at[:, :hidden].set(w1)
    b1 = jnp.zeros((1, H_pad), jnp.float32).at[0, :hidden].set(
        conv_b.astype(jnp.float32))
    w2 = lin_w.T.astype(compute_dtype)                                  # (hidden, out)
    w2 = jnp.zeros((H_pad, N_pad), compute_dtype).at[:hidden, :out_dim].set(w2)
    b2 = jnp.zeros((1, N_pad), jnp.float32).at[0, :out_dim].set(
        lin_b.astype(jnp.float32))

    return dict(w1=w1, b1=b1, w2=w2, b2=b2,
                K=K, H_pad=H_pad, N_pad=N_pad,
                out_dim=out_dim, patch_len=patch_len,
                compute_dtype=compute_dtype)


def patchtst_forward(x, params, tile_b=_DEF_TILE_B, out_dtype=jnp.bfloat16):
    """x: (B, C_in, L) with L == patch_len (as the module's forward implies).

    Returns: (B, output_dim) in `out_dtype` (bf16 by default to halve HBM
    writeback; pass jnp.float32 if downstream needs full precision).
    """
    B, C_in, L = x.shape
    assert L == params["patch_len"], "PatchTST forward requires seq_len == patch_len"
    K = params["K"]
    H_pad, N_pad = params["H_pad"], params["N_pad"]
    out_dim = params["out_dim"]
    assert C_in * L == K

    # Metadata-only flatten: no pad, no dtype cast (kernel casts on the VPU).
    x_flat = x.reshape(B, K)

    # ---- batch-tile selection -------------------------------------------
    tb = min(int(tile_b), _round_up(max(B, 1), _BF16_SUBLANE))
    # Keep >= 2 grid steps when there is enough work (both v7x TCs busy).
    if B > 2 * _BF16_SUBLANE:
        tb = min(tb, _round_up(pl.cdiv(B, 2), _BF16_SUBLANE))
    # VMEM budget: double-buffered x block + double-buffered out block.
    bytes_per_row = 2 * (K * x_flat.dtype.itemsize
                         + N_pad * jnp.dtype(out_dtype).itemsize)
    vmem_cap = max(_BF16_SUBLANE,
                   (_VMEM_TILE_BUDGET // bytes_per_row)
                   // _BF16_SUBLANE * _BF16_SUBLANE)
    tb = min(tb, vmem_cap)
    tb = max(_BF16_SUBLANE, _round_up(tb, _BF16_SUBLANE))

    grid = (pl.cdiv(B, tb),)

    w_itemsize = jnp.dtype(params["compute_dtype"]).itemsize
    cost = pl.CostEstimate(
        flops=2 * B * K * H_pad + 2 * B * H_pad * N_pad,
        transcendentals=0,
        bytes_accessed=(B * K * x_flat.dtype.itemsize            # x read
                        + K * H_pad * w_itemsize                 # w1
                        + H_pad * N_pad * w_itemsize             # w2
                        + (H_pad + N_pad) * 4                    # biases
                        + B * N_pad * jnp.dtype(out_dtype).itemsize),  # out write
    )

    out = pl.pallas_call(
        _patchtst_kernel,
        out_shape=jax.ShapeDtypeStruct((B, N_pad), out_dtype),
        grid_spec=pltpu.PrefetchScalarGridSpec(
            num_scalar_prefetch=0,
            grid=grid,
            in_specs=[
                pl.BlockSpec((tb, K), lambda i: (i, 0)),         # x: batch-tiled
                pl.BlockSpec((K, H_pad), lambda i: (0, 0)),      # w1: resident
                pl.BlockSpec((1, H_pad), lambda i: (0, 0)),      # b1: resident
                pl.BlockSpec((H_pad, N_pad), lambda i: (0, 0)),  # w2: resident
                pl.BlockSpec((1, N_pad), lambda i: (0, 0)),      # b2: resident
            ],
            out_specs=pl.BlockSpec((tb, N_pad), lambda i: (i, 0)),
        ),
        compiler_params=pltpu.CompilerParams(
            dimension_semantics=("parallel",),       # shard batch across TCs
            vmem_limit_bytes=48 * 1024 * 1024,       # headroom under v7x 64 MiB
        ),
        cost_estimate=cost,
    )(x_flat, params["w1"], params["b1"], params["w2"], params["b2"])

    # Strip lane padding back to the real output columns (no batch padding).
    return out[:, :out_dim]


def _pure_jax_ref_f32(x, conv_w, conv_b, lin_w, lin_b, patch_len):
    """Pure f32 reference (module semantics)."""
    B, C_in, L = x.shape
    hidden = conv_w.shape[0]
    x_flat = x.reshape(B, C_in * patch_len)
    h = jnp.dot(x_flat, conv_w.reshape(hidden, -1).T,
                precision=jax.lax.Precision.HIGHEST) + conv_b
    h = jnp.maximum(h, 0.0)
    return jnp.dot(h, lin_w.T, precision=jax.lax.Precision.HIGHEST) + lin_b


def _pure_jax_ref_bf16(x, conv_w, conv_b, lin_w, lin_b, patch_len, out_dtype):
    """Reference mimicking the kernel's bf16 operands / f32 acc / bf16 output."""
    B, C_in, L = x.shape
    hidden = conv_w.shape[0]
    q = lambda a: a.astype(jnp.bfloat16).astype(jnp.float32)
    x_flat = q(x.reshape(B, C_in * patch_len))
    w1 = q(conv_w.reshape(hidden, -1).T)
    h = jnp.dot(x_flat, w1, precision=jax.lax.Precision.HIGHEST) + conv_b
    h = jnp.maximum(h, 0.0)
    y = jnp.dot(q(h), q(lin_w.T), precision=jax.lax.Precision.HIGHEST) + lin_b
    return y.astype(out_dtype).astype(jnp.float32)


if __name__ == "__main__":
    input_dim, output_dim, patch_len = 1, 1, 16
    hidden = 64

    key = jax.random.PRNGKey(0)
    k_x, k_x2, k_cw, k_cb, k_lw, k_lb = jax.random.split(key, 6)

    # Deterministic synthetic parameters (shapes from the module __init__).
    conv_w = jax.random.normal(k_cw, (hidden, input_dim, patch_len), jnp.float32) * 0.1
    conv_b = jax.random.normal(k_cb, (hidden,), jnp.float32) * 0.1
    lin_w = jax.random.normal(k_lw, (output_dim, hidden), jnp.float32) * 0.1
    lin_b = jax.random.normal(k_lb, (output_dim,), jnp.float32) * 0.1

    # One-time parameter prep (hoisted out of the forward).
    params = prepare_params(conv_w, conv_b, lin_w, lin_b, patch_len)
    fwd = jax.jit(functools.partial(patchtst_forward, params=params))

    def check(batch, xkey):
        x = jax.random.normal(xkey, (batch, input_dim, patch_len), jnp.float32)
        y = jax.block_until_ready(fwd(x)).astype(jnp.float32)
        assert y.shape == (batch, output_dim)
        # Tight check vs. a reference mimicking the kernel's bf16 data path.
        y_bf = _pure_jax_ref_bf16(x, conv_w, conv_b, lin_w, lin_b, patch_len,
                                  jnp.bfloat16)
        assert jnp.allclose(y, y_bf, atol=2e-2, rtol=2e-2), (
            float(jnp.max(jnp.abs(y - y_bf))))
        # Semantic check vs. the pure-f32 module reference (bf16-sized tol).
        y_f32 = _pure_jax_ref_f32(x, conv_w, conv_b, lin_w, lin_b, patch_len)
        assert jnp.allclose(y, y_f32, atol=5e-2, rtol=5e-2), (
            float(jnp.max(jnp.abs(y - y_f32))))

    # Small shape from the spec (batch=2, input_dim=1, seq_len=patch_len=16).
    check(2, k_x)
    # Ragged batch (not a multiple of the tile) exercising a 2-step grid and
    # the masked edge block.
    check(37, k_x2)

    print("KERNEL_OK")
</pallas_src>

<mosaic_0001>
module attributes {stable_mosaic.version = 11 : i64} {
  func.func @_patchtst_kernel(%arg0: i32, %arg1: memref<16x16xf32, #tpu.memory_space<vmem>>, %arg2: memref<16x128xbf16, #tpu.memory_space<vmem>>, %arg3: memref<1x128xf32, #tpu.memory_space<vmem>>, %arg4: memref<128x128xbf16, #tpu.memory_space<vmem>>, %arg5: memref<1x128xf32, #tpu.memory_space<vmem>>, %arg6: memref<16x128xbf16, #tpu.memory_space<vmem>>) attributes {dimension_semantics = [#tpu.dimension_semantics<parallel>], iteration_bounds = array<i64: 1>, scalar_prefetch = 0 : i64, scratch_operands = 0 : i64, tpu.core_type = #tpu.core_type<tc>, window_params = [{transform_indices = @transform_0, window_bounds = array<i64: 16, 16>}, {pipeline_mode = #tpu.pipeline_mode<synchronous>, transform_indices = @transform_1, window_bounds = array<i64: 16, 128>}, {pipeline_mode = #tpu.pipeline_mode<synchronous>, transform_indices = @transform_2, window_bounds = array<i64: 1, 128>}, {pipeline_mode = #tpu.pipeline_mode<synchronous>, transform_indices = @transform_3, window_bounds = array<i64: 128, 128>}, {pipeline_mode = #tpu.pipeline_mode<synchronous>, transform_indices = @transform_4, window_bounds = array<i64: 1, 128>}, {transform_indices = @transform_5, window_bounds = array<i64: 16, 128>}]} {
    %c0 = arith.constant 0 : index
    %c0_0 = arith.constant 0 : index
    %0 = vector.load %arg1[%c0, %c0_0] : memref<16x16xf32, #tpu.memory_space<vmem>>, vector<16x16xf32>
    %1 = arith.truncf %0 : vector<16x16xf32> to vector<16x16xbf16>
    %c0_1 = arith.constant 0 : index
    %c0_2 = arith.constant 0 : index
    %2 = vector.load %arg2[%c0_1, %c0_2] : memref<16x128xbf16, #tpu.memory_space<vmem>>, vector<16x128xbf16>
    %cst = arith.constant dense<0.000000e+00> : vector<16x128xf32>
    %3 = tpu.matmul %1, %2, %cst {dimension_numbers = #tpu.dot_dimension_numbers<[1], [0], [0], [1], [0, 0, 1, 1], [], []>} : vector<16x16xbf16>, vector<16x128xbf16>, vector<16x128xf32> -> vector<16x128xf32>
    %c0_3 = arith.constant 0 : index
    %c0_4 = arith.constant 0 : index
    %4 = vector.load %arg3[%c0_3, %c0_4] : memref<1x128xf32, #tpu.memory_space<vmem>>, vector<1x128xf32>
    %5 = vector.broadcast %4 : vector<1x128xf32> to vector<16x128xf32>
    %6 = arith.addf %3, %5 : vector<16x128xf32>
    %cst_5 = arith.constant 0.000000e+00 : f32
    %7 = vector.broadcast %cst_5 : f32 to vector<16x128xf32>
    %8 = arith.maximumf %6, %7 : vector<16x128xf32>
    %9 = arith.truncf %8 : vector<16x128xf32> to vector<16x128xbf16>
    %c0_6 = arith.constant 0 : index
    %c0_7 = arith.constant 0 : index
    %10 = vector.load %arg4[%c0_6, %c0_7] : memref<128x128xbf16, #tpu.memory_space<vmem>>, vector<128x128xbf16>
    %cst_8 = arith.constant dense<0.000000e+00> : vector<16x128xf32>
    %11 = tpu.matmul %9, %10, %cst_8 {dimension_numbers = #tpu.dot_dimension_numbers<[1], [0], [0], [1], [0, 0, 1, 1], [], []>} : vector<16x128xbf16>, vector<128x128xbf16>, vector<16x128xf32> -> vector<16x128xf32>
    %c0_9 = arith.constant 0 : index
    %c0_10 = arith.constant 0 : index
    %12 = vector.load %arg5[%c0_9, %c0_10] : memref<1x128xf32, #tpu.memory_space<vmem>>, vector<1x128xf32>
    %13 = vector.broadcast %12 : vector<1x128xf32> to vector<16x128xf32>
    %14 = arith.addf %11, %13 : vector<16x128xf32>
    %15 = arith.truncf %14 : vector<16x128xf32> to vector<16x128xbf16>
    %c0_11 = arith.constant 0 : index
    %c0_12 = arith.constant 0 : index
    %16 = vector.load %arg6[%c0_11, %c0_12] : memref<16x128xbf16, #tpu.memory_space<vmem>>, vector<16x128xbf16>
    tpu.vector_store %arg6[%c0_11, %c0_12], %15 {strides = array<i32>} : memref<16x128xbf16, #tpu.memory_space<vmem>>, vector<16x128xbf16>,
    return
  }
  func.func @transform_0(%arg0: i32) -> (i32, i32) {
    %c0_i32 = arith.constant 0 : i32
    %c0_i32_0 = arith.constant 0 : i32
    return %arg0, %c0_i32 : i32, i32
  }
  func.func @transform_1(%arg0: i32) -> (i32, i32) {
    %c0_i32 = arith.constant 0 : i32
    %c0_i32_0 = arith.constant 0 : i32
    %c0_i32_1 = arith.constant 0 : i32
    return %c0_i32, %c0_i32_0 : i32, i32
  }
  func.func @transform_2(%arg0: i32) -> (i32, i32) {
    %c0_i32 = arith.constant 0 : i32
    %c0_i32_0 = arith.constant 0 : i32
    %c0_i32_1 = arith.constant 0 : i32
    return %c0_i32, %c0_i32_0 : i32, i32
  }
  func.func @transform_3(%arg0: i32) -> (i32, i32) {
    %c0_i32 = arith.constant 0 : i32
    %c0_i32_0 = arith.constant 0 : i32
    %c0_i32_1 = arith.constant 0 : i32
    return %c0_i32, %c0_i32_0 : i32, i32
  }
  func.func @transform_4(%arg0: i32) -> (i32, i32) {
    %c0_i32 = arith.constant 0 : i32
    %c0_i32_0 = arith.constant 0 : i32
    %c0_i32_1 = arith.constant 0 : i32
    return %c0_i32, %c0_i32_0 : i32, i32
  }
  func.func @transform_5(%arg0: i32) -> (i32, i32) {
    %c0_i32 = arith.constant 0 : i32
    %c0_i32_0 = arith.constant 0 : i32
    return %arg0, %c0_i32 : i32, i32
  }
}

</mosaic_0001>

<bundles_post_ra>
// kernel: patchtst_forward.1
= control target key start
LH: loop header
LB: loop body
LE: loop exit
PB: predicated region body
PF: predicated region fallthrough
CT: control target
= control target key end

     0   :  { %10 = vsyncpa [#allocation3], 0  ;;  %s496_s0 = inlined_call_operand.vmem [shape: f32[2,16], index: 0, kind: input, shape index: {}]   ;;  %s497_s1 = inlined_call_operand.vmem [shape: bf16[16,128], index: 1, kind: input, shape index: {}]   ;;  %s498_s2 = inlined_call_operand.vmem [shape: f32[1,128], index: 2, kind: input, shape index: {}]   ;;  %s499_s3 = inlined_call_operand.hbm [shape: bf16[128,128], index: 3, kind: input, shape index: {}]   ;;  %s500_s4 = inlined_call_operand.vmem [shape: f32[1,128], index: 4, kind: input, shape index: {}]   ;;  %s501_s5 = inlined_call_operand.hbm [shape: bf16[2,128], index: 5, kind: output, shape index: {}]  }
   0x1   :  { %11 = vsyncpa [#allocation4], 0  ;;  %s418_s18 = smov [#allocation2]   ;;  %s370_s22 = scalar_lea.hbm %s499_s3, 1024 }
   0x2   :  { %s23_s19 = sshll.u32 %s418_s18, 4  ;;  %p371_p0 = scmp.ne.s32.totalorder %s499_s3, %s370_s22  ;;  %s24_s19 = int_to_ptr.vmem [resolvable:$true] %s23_s19 }
   0x3   :  { %p374_p1 = scmp.lt.u32.totalorder %s370_s22, %s499_s3 }
   0x5   :  { %p376_p2 = pnand %p374_p1, %p371_p0 }
   0x7   :  { %379 = shalt.err (!%p376_p2)
}
   0x8   :  { %s380_s27 = scalar_lea.vmem %s24_s19, 1024  ;;  %p385_p4 = scmp.lt.s32.totalorder %s24_s19, %s24_s19 }
   0x9   :  { %p381_p3 = scmp.ne.s32.totalorder %s24_s19, %s380_s27  ;;  %p386_p5 = scmp.lt.s32.totalorder %s380_s27, %s380_s27 }
   0xb   :  { %p387_p6 = por %p386_p5, %p385_p4 }
   0xd   :  { %p388_p7 = pnand %p387_p6, %p381_p3 }
   0xf   :  { %391 = shalt.err (!%p388_p7)
}
  0x10   :  { %s419_s28 = smov 64   ;;  %s420_s29 = smov 4  }
  0x11   :  { %29 = dma.hbm_to_vmem [thread:$0]  %s499_s3, 1024, %s24_s19, [#allocation3], %s419_s28, %s419_s28, %s420_s29  }
  0x12   :  { %414 = dma.done.wait [#allocation3], 1024  }
  0x13   :  { %415 = vsyncadd [#allocation3], 4294966272  ;;  %v421_v0 = vmov 0.0   ;;  %vm422_vm0 = vmmov 0   ;;  %v361_v1 = vld [vmem:[%s497_s1] sm:$0xff]   ;;  %v37_v3 = vld [vmem:[%s496_s0 + $0x8] sm:$0xff]  ;;  %v220_v25 = vlaneseq }
  0x14   :  { %326 = vmatprep.subr.bf16.mxu0 %v421_v0  ;;  %328 = vmatprep.mubr.msk.bf16.mxu0 %vm422_vm0, %v421_v0  ;;  %v36_v2 = vld [vmem:[%s496_s0] sm:$0xff]  ;;  %vm54_vm1 = vcmask 130048   ;;  %v363_v6 = vld [vmem:[#allocation2 + $0x8] sm:$0xff]   ;;  %v364_v7 = vld [vmem:[#allocation2 + $0x10] sm:$0xff]   ;;  %v423_v23 = vmov 1966171168  }
  0x15   :  { %332 = vmatprep.subr.bf16.mxu1 %v421_v0  ;;  %348 = vmatprep.mubr.msk.bf16.mxu1 %vm422_vm0, %v421_v0  ;;  %v38_v4 = vpack.c.bf16 %v37_v3, %v36_v2  ;;  %v362_v5 = vld [vmem:[#allocation2] sm:$0xff]   ;;  %v365_v8 = vld [vmem:[#allocation2 + $0x18] sm:$0xff]   ;;  %v367_v10 = vld [vmem:[#allocation2 + $0x28] sm:$0xff]   ;;  %v218_v24 = vunpack.c.l.s4 %v423_v23  ;;  %v221_v27 = vshrl.u32 %v220_v25, 7 }
  0x16   :  { %327 = vmatpush3.bf16.msra.mxu0 %v361_v1  ;;  %333 = vmatpush3.bf16.msra.mxu1 %v362_v5  ;;  %v366_v9 = vld [vmem:[#allocation2 + $0x20] sm:$0xff]   ;;  %v368_v11 = vld [vmem:[#allocation2 + $0x30] sm:$0xff]   ;;  %v369_v12 = vld [vmem:[#allocation2 + $0x38] sm:$0xff]  }
  0x17   :  { %334 = vmatprep.subr.bf16.mxu1 %v421_v0  ;;  %v298_v13 = vld [vmem:[%s498_s2] ss:$0 sm:$0xff]  ;;  %v219_v26 = vunpack.c.0.s8 %v218_v24 }
  0x18   :  { %v301_v28 = vld [vmem:[%s500_s4] ss:$0 sm:$0xff] }
  0x19   :  { %329 = vmatmul.mubr.msk.bf16.vlgmr.msra.gmra.mrb[0].mxu0 %vm54_vm1, %v38_v4  ;;  %v222_v34 = vsub.s32 %v219_v26, %v221_v27 }
  0x1a   :  { %335 = vmatpush3.bf16.msra.mxu1 %v363_v6 }
  0x1b   :  { %336 = vmatprep.subr.bf16.mxu1 %v421_v0 }
  0x1e   :  { %337 = vmatpush3.bf16.msra.mxu1 %v364_v7 }
  0x1f   :  { %338 = vmatprep.subr.bf16.mxu1 %v421_v0 }
  0x22   :  { %339 = vmatpush3.bf16.msra.mxu1 %v365_v8 }
  0x23   :  { %340 = vmatprep.subr.bf16.mxu1 %v421_v0 }
  0x26   :  { %341 = vmatpush3.bf16.msra.mxu1 %v366_v9 }
  0x27   :  { %342 = vmatprep.subr.bf16.mxu1 %v421_v0 }
  0x2a   :  { %343 = vmatpush3.bf16.msra.mxu1 %v367_v10 }
  0x2b   :  { %344 = vmatprep.subr.bf16.mxu1 %v421_v0 }
  0x2e   :  { %345 = vmatpush3.bf16.msra.mxu1 %v368_v11 }
  0x2f   :  { %346 = vmatprep.subr.bf16.mxu1 %v421_v0 }
  0x32   :  { %347 = vmatpush3.bf16.msra.mxu1 %v369_v12 }
  0xec   :  { %v92_v14 = vpop.f32.mrb[0].mxu0 }
  0xed   :  { %v93_v15 = vadd.f32 %v298_v13, %v92_v14  ;;  %v330_v16 = vpop.f32.mrb[1].mxu0 }
  0xee   :  { %v95_v17 = vpop.f32.mrb[2].mxu0 }
  0xef   :  { %v96_v18 = vadd.f32 %v298_v13, %v95_v17  ;;  %v331_v19 = vpop.f32.mrb[3].mxu0  ;;  %v99_v20 = vmax.f32 %v93_v15, 0.0 }
  0xf1   :  { %v100_v21 = vmax.f32 %v96_v18, 0.0 }
  0xf3   :  { %v101_v22 = vpack.c.bf16 %v100_v21, %v99_v20 }
  0xf5   :  { %349 = vmatmul.mubr.bf16.vlgmr.msra.gmra.mrb[0].mxu1 %v101_v22 }
 0x1c8   :  { %v207_v29 = vpop.f32.mrb[0].mxu1 }
 0x1c9   :  { %v350_v30 = vpop.f32.mrb[1].mxu1  ;;  %v208_v32 = vadd.f32 %v301_v28, %v207_v29 }
 0x1ca   :  { %v210_v31 = vpop.f32.mrb[2].mxu1 }
 0x1cb   :  { %v211_v33 = vadd.f32 %v301_v28, %v210_v31  ;;  %v351_v35 = vpop.f32.mrb[3].mxu1 }
 0x1cd   :  { %v214_v36 = vpack.c.bf16 %v211_v33, %v208_v32  ;;  %v310_v37 = vpack.c.bf16 %v211_v33, %v211_v33 }
 0x1cf   :  { %v223_v38 = vrot.slane %v214_v36, %v222_v34  ;;  %v230_v39 = vrot.slane %v310_v37, %v222_v34 }
 0x1d1   :  { %v231_v40 = vcombine.high %v223_v38, %v223_v38  ;;  %v232_v41 = vcombine.high %v230_v39, %v230_v39  ;;  %v239_v42 = vrot.slane %v223_v38, %v222_v34  ;;  %v246_v43 = vrot.slane %v230_v39, %v222_v34  ;;  %311 = vst.sshfl [vmem:[#allocation5] sm:$0x1 pattern:$0x73625140] %v223_v38 }
 0x1d2   :  { %313 = vst.sshfl [vmem:[#allocation5 + $0x4] sm:$0x1 pattern:$0x73625140] %v230_v39 }
 0x1d3   :  { %v253_v44 = vrot.slane %v231_v40, %v222_v34  ;;  %v260_v45 = vrot.slane %v232_v41, %v222_v34  ;;  %v261_v46 = vcombine.high %v239_v42, %v239_v42  ;;  %v262_v47 = vcombine.high %v246_v43, %v246_v43  ;;  %312 = vst.sshfl [vmem:[#allocation5 + $0x1] sm:$0x1 pattern:$0x73625140] %v231_v40 }
 0x1d4   :  { %314 = vst.sshfl [vmem:[#allocation5 + $0x5] sm:$0x1 pattern:$0x73625140] %v232_v41 }
 0x1d5   :  { %v263_v48 = vcombine.high %v253_v44, %v253_v44  ;;  %v264_v49 = vcombine.high %v260_v45, %v260_v45  ;;  %275 = vst [vmem:[#allocation5 + $0x2] sm:$0x1] %v261_v46  ;;  %279 = vst [vmem:[#allocation5 + $0x6] sm:$0x1] %v262_v47 }
 0x1d7   :  { %276 = vst [vmem:[#allocation5 + $0x3] sm:$0x1] %v263_v48  ;;  %280 = vst [vmem:[#allocation5 + $0x7] sm:$0x1] %v264_v49 }
 0x1d8   :  { %285 = vsyncadd [#allocation4], 112  ;;  %s424_s2 = smov [#allocation5]  }
 0x1d9   :  { %s286_s4 = sshll.u32 %s424_s2, 4  ;;  %s287_s4 = int_to_ptr.vmem [resolvable:$true] %s286_s4 }
 0x1da   :  { %s392_s14 = scalar_lea.vmem %s287_s4, 16  ;;  %s396_s15 = scalar_lea.vmem %s287_s4, 128 }
 0x1db   :  { %p393_p8 = scmp.ne.s32.totalorder %s287_s4, %s392_s14  ;;  %p397_p9 = scmp.lt.s32.totalorder %s287_s4, %s287_s4 }
 0x1dc   :  { %p398_p10 = scmp.lt.s32.totalorder %s396_s15, %s392_s14 }
 0x1de   :  { %p399_p11 = por %p398_p10, %p397_p9 }
 0x1e0   :  { %p400_p12 = pnand %p399_p11, %p393_p8 }
 0x1e2   :  { %403 = shalt.err (!%p400_p12)
}
 0x1e3   :  { %s404_s18 = scalar_lea.hbm %s501_s5, 16 }
 0x1e4   :  { %p405_p13 = scmp.ne.s32.totalorder %s501_s5, %s404_s18  ;;  %p408_p0 = scmp.lt.u32.totalorder %s404_s18, %s501_s5 }
 0x1e6   :  { %p410_p1 = pnand %p408_p0, %p405_p13 }
 0x1e8   :  { %413 = shalt.err (!%p410_p1)
}
 0x1e9   :  { %s425_s23 = smov 16   ;;  %s426_s24 = smov 1  }
 0x1ea   :  { %292 = dma.vmem_to_hbm [thread:$0]  %s287_s4, 16, %s501_s5, [#allocation4], %s425_s23, %s425_s23, %s426_s24  }
 0x1eb   :  { %416 = dma.done.wait [#allocation4], 128  }
 0x1ec   :  { %417 = vsyncadd [#allocation4], 4294967168 }
 0x1ed   :  { %296 = vsyncpa [#allocation3], 1 }
 0x1ee   :  { %297 = vsyncpa [#allocation4], 1 }

</bundles_post_ra>
